<compile_context>
chip_gen: v6e
topology: v6e:2x2x1
jax: 0.10.0
libtpu: 0.0.40
codegen_flags: <defaults>
</compile_context>

<pallas_src>
import functools

import jax
import jax.numpy as jnp
from jax.experimental import pallas as pl
from jax.experimental.pallas import tpu as pltpu


_LANE = 128           # lane-dense last dim (multiple of 128 -> unmasked stores)
_MAX_TILE_ROWS = 2048  # 2048 * 128 * 4 B = 1 MiB per f32 tile


def _residual_dropout_kernel(seed_ref, x_ref, o_ref, *, drop_rate: float):
    """out = x + dropout(x) on one (tile_rows, 128) block."""
    rows_blk, lane = x_ref.shape
    pid = pl.program_id(0)

    # Global flat element index of every element in this tile.
    row = jax.lax.broadcasted_iota(jnp.int32, (rows_blk, lane), 0)
    col = jax.lax.broadcasted_iota(jnp.int32, (rows_blk, lane), 1)
    grow = row + pid * rows_blk
    gidx = grow.astype(jnp.uint32) * jnp.uint32(lane) + col.astype(jnp.uint32)

    # Counter-based PRNG: mix(global_index, seed) -> 32 random bits / element.
    seed_u = seed_ref[0].astype(jnp.uint32)
    h = gidx ^ (seed_u * jnp.uint32(0x9E3779B9))
    h = h ^ (h >> 16)
    h = h * jnp.uint32(0x85EBCA6B)
    h = h ^ (h >> 13)
    h = h * jnp.uint32(0xC2B2AE35)
    h = h ^ (h >> 16)

    threshold = jnp.uint32(min(int(round(drop_rate * (2.0 ** 32))), 2 ** 32 - 1))
    keep = h >= threshold  # P(keep) = 1 - drop_rate

    # Fused residual + inverted dropout: x * (1 + keep/(1-p)).
    kept_factor = jnp.float32(1.0 + 1.0 / (1.0 - drop_rate))
    factor = jnp.where(keep, kept_factor, jnp.float32(1.0))
    o_ref[...] = (x_ref[...].astype(jnp.float32) * factor).astype(o_ref.dtype)


def residual_connection(x, drop_rate: float, seed: int = 0, training: bool = True):
    """JAX wrapper reproducing ResidualConnection.forward(x) = x + dropout(x)."""
    if (not training) or drop_rate == 0.0:
        return x + x              # eval mode / p == 0: dropout is identity
    if drop_rate >= 1.0:
        return x                  # p == 1: dropout(x) == 0 -> out = x

    orig_shape = x.shape
    total = x.size

    # Lane-dense 2-D slab: (rows, 128).  Round rows up to a multiple of 16
    # (covers bf16 sublane packing too), then pick the row-tile size.
    rows = (total + _LANE - 1) // _LANE
    rows = ((rows + 15) // 16) * 16
    if rows <= _MAX_TILE_ROWS:
        tile_rows = rows
        rows_p = rows
    else:
        tile_rows = _MAX_TILE_ROWS
        rows_p = ((rows + tile_rows - 1) // tile_rows) * tile_rows
    padded = rows_p * _LANE

    x_flat = x.reshape(-1)
    if padded != total:
        x_flat = jnp.pad(x_flat, (0, padded - total))
    x2 = x_flat.reshape(rows_p, _LANE)

    seed_arr = jnp.array([seed], dtype=jnp.int32)
    n_tiles = rows_p // tile_rows

    out = pl.pallas_call(
        functools.partial(_residual_dropout_kernel, drop_rate=float(drop_rate)),
        out_shape=jax.ShapeDtypeStruct((rows_p, _LANE), x.dtype),
        grid_spec=pltpu.PrefetchScalarGridSpec(
            num_scalar_prefetch=1,
            grid=(n_tiles,),
            in_specs=[pl.BlockSpec((tile_rows, _LANE), lambda i, seed: (i, 0))],
            out_specs=pl.BlockSpec((tile_rows, _LANE), lambda i, seed: (i, 0)),
        ),
        compiler_params=pltpu.CompilerParams(
            dimension_semantics=("parallel",),
        ),
    )(seed_arr, x2)

    return out.reshape(-1)[:total].reshape(orig_shape)


if __name__ == "__main__":
    key = jax.random.PRNGKey(0)
    batch, seq, hidden = 2, 8, 32
    drop_rate = 0.1

    x = jax.random.normal(key, (batch, seq, hidden), dtype=jnp.float32)

    out = residual_connection(x, drop_rate=drop_rate, seed=0, training=True)
    out = jax.block_until_ready(out)
    assert out.shape == x.shape and out.dtype == x.dtype

    # Every element must be either x (dropped) or x * (1 + 1/(1-p)) (kept).
    kept_val = x * (1.0 + 1.0 / (1.0 - drop_rate))
    is_drop = jnp.isclose(out, x, atol=1e-5)
    is_keep = jnp.isclose(out, kept_val, atol=1e-5)
    assert bool(jnp.all(is_drop | is_keep)), "elements not consistent with x + dropout(x)"

    # The mask should actually vary (some kept, some dropped) for 512 elems @ p=0.1.
    nonzero = jnp.abs(x) > 1e-6
    assert bool(jnp.any(is_keep & ~is_drop & nonzero)), "no elements were kept"
    assert bool(jnp.any(is_drop & ~is_keep & nonzero)), "no elements were dropped"

    # Eval mode (identity dropout): out == 2 * x exactly.
    out_eval = jax.block_until_ready(
        residual_connection(x, drop_rate=drop_rate, seed=0, training=False)
    )
    assert bool(jnp.allclose(out_eval, 2.0 * x)), "eval-mode mismatch"

    print("KERNEL_OK")
</pallas_src>

<mosaic_0001>
module attributes {stable_mosaic.version = 11 : i64} {
  func.func @_residual_dropout_kernel(%arg0: i32, %arg1: memref<1xi32, #tpu.memory_space<smem>>, %arg2: memref<16x128xf32, #tpu.memory_space<vmem>>, %arg3: memref<16x128xf32, #tpu.memory_space<vmem>>) attributes {dimension_semantics = [#tpu.dimension_semantics<parallel>], iteration_bounds = array<i64: 1>, scalar_prefetch = 1 : i64, scratch_operands = 0 : i64, tpu.core_type = #tpu.core_type<tc>, window_params = [{transform_indices = @transform_0, window_bounds = array<i64: 16, 128>}, {transform_indices = @transform_1, window_bounds = array<i64: 16, 128>}]} {
    %0 = tpu.iota {dimensions = array<i32: 0>} : vector<16x128xi32>
    %1 = tpu.iota {dimensions = array<i32: 1>} : vector<16x128xi32>
    %c16_i32 = arith.constant 16 : i32
    %2 = arith.muli %arg0, %c16_i32 : i32
    %3 = vector.broadcast %2 : i32 to vector<16x128xi32>
    %4 = arith.addi %0, %3 : vector<16x128xi32>
    %c128_i32 = arith.constant 128 : i32
    %5 = vector.broadcast %c128_i32 : i32 to vector<16x128xi32>
    %6 = arith.muli %4, %5 : vector<16x128xi32>
    %7 = arith.addi %6, %1 : vector<16x128xi32>
    %c0 = arith.constant 0 : index
    %8 = memref.load %arg1[%c0] : memref<1xi32, #tpu.memory_space<smem>>
    %c-1640531527_i32 = arith.constant -1640531527 : i32
    %9 = arith.muli %8, %c-1640531527_i32 : i32
    %10 = vector.broadcast %9 : i32 to vector<16x128xi32>
    %11 = arith.xori %7, %10 : vector<16x128xi32>
    %c16_i32_0 = arith.constant 16 : i32
    %12 = vector.broadcast %c16_i32_0 : i32 to vector<16x128xi32>
    %13 = arith.shrui %11, %12 : vector<16x128xi32>
    %14 = arith.xori %11, %13 : vector<16x128xi32>
    %c-2048144789_i32 = arith.constant -2048144789 : i32
    %15 = vector.broadcast %c-2048144789_i32 : i32 to vector<16x128xi32>
    %16 = arith.muli %14, %15 : vector<16x128xi32>
    %c13_i32 = arith.constant 13 : i32
    %17 = vector.broadcast %c13_i32 : i32 to vector<16x128xi32>
    %18 = arith.shrui %16, %17 : vector<16x128xi32>
    %19 = arith.xori %16, %18 : vector<16x128xi32>
    %c-1028477387_i32 = arith.constant -1028477387 : i32
    %20 = vector.broadcast %c-1028477387_i32 : i32 to vector<16x128xi32>
    %21 = arith.muli %19, %20 : vector<16x128xi32>
    %c16_i32_1 = arith.constant 16 : i32
    %22 = vector.broadcast %c16_i32_1 : i32 to vector<16x128xi32>
    %23 = arith.shrui %21, %22 : vector<16x128xi32>
    %24 = arith.xori %21, %23 : vector<16x128xi32>
    %c429496730_i32 = arith.constant 429496730 : i32
    %25 = vector.broadcast %c429496730_i32 : i32 to vector<16x128xi32>
    %26 = arith.cmpi uge, %24, %25 : vector<16x128xi32>
    %cst = arith.constant 2.11111116 : f32
    %cst_2 = arith.constant 1.000000e+00 : f32
    %27 = vector.broadcast %cst : f32 to vector<16x128xf32>
    %28 = vector.broadcast %cst_2 : f32 to vector<16x128xf32>
    %29 = arith.select %26, %27, %28 : vector<16x128xi1>, vector<16x128xf32>
    %c0_3 = arith.constant 0 : index
    %c0_4 = arith.constant 0 : index
    %30 = vector.load %arg2[%c0_3, %c0_4] : memref<16x128xf32, #tpu.memory_space<vmem>>, vector<16x128xf32>
    %31 = arith.mulf %30, %29 : vector<16x128xf32>
    %c0_5 = arith.constant 0 : index
    %c0_6 = arith.constant 0 : index
    %32 = vector.load %arg3[%c0_5, %c0_6] : memref<16x128xf32, #tpu.memory_space<vmem>>, vector<16x128xf32>
    tpu.vector_store %arg3[%c0_5, %c0_6], %31 {strides = array<i32>} : memref<16x128xf32, #tpu.memory_space<vmem>>, vector<16x128xf32>,
    return
  }
  func.func @transform_0(%arg0: i32, %arg1: memref<1xi32, #tpu.memory_space<smem>>) -> (i32, i32) {
    %c0_i32 = arith.constant 0 : i32
    %c0_i32_0 = arith.constant 0 : i32
    return %arg0, %c0_i32 : i32, i32
  }
  func.func @transform_1(%arg0: i32, %arg1: memref<1xi32, #tpu.memory_space<smem>>) -> (i32, i32) {
    %c0_i32 = arith.constant 0 : i32
    %c0_i32_0 = arith.constant 0 : i32
    return %arg0, %c0_i32 : i32, i32
  }
}

</mosaic_0001>

<bundles_post_ra>
// kernel: tpu_custom_call.1
= control target key start
LH: loop header
LB: loop body
LE: loop exit
PB: predicated region body
PF: predicated region fallthrough
CT: control target
= control target key end

     0   :  { %8 = vsyncpa [#allocation5], 0  ;;  %s170_s0 = inlined_call_operand.<no memory space> [shape: s32[1], index: 0, kind: input, shape index: {}]   ;;  %s171_s1 = inlined_call_operand.hbm [shape: f32[16,128], index: 1, kind: input, shape index: {}]   ;;  %s172_s2 = inlined_call_operand.hbm [shape: f32[16,128], index: 2, kind: output, shape index: {}]  }
   0x1   :  { %9 = vsyncpa [#allocation6], 0  ;;  %s135_s9 = smov [#allocation4]  }
   0x2   :  { %s15_s10 = sshll.u32 %s135_s9, 4  ;;  %s16_s10 = int_to_ptr.vmem [resolvable:$true] %s15_s10 }
   0x3   :  { %s99_s11 = scalar_lea.vmem %s16_s10, 256  ;;  %p104_p1 = scmp.lt.s32.totalorder %s16_s10, %s16_s10 }
   0x4   :  { %p100_p0 = scmp.ne.s32.totalorder %s16_s10, %s99_s11  ;;  %p105_p2 = scmp.lt.s32.totalorder %s99_s11, %s99_s11 }
   0x6   :  { %p106_p3 = por %p105_p2, %p104_p1 }
   0x8   :  { %p107_p4 = pnand %p106_p3, %p100_p0 }
   0xa   :  { %110 = shalt.err (!%p107_p4)
}
   0xb   :  { %s136_s12 = smov 128   ;;  %s137_s13 = smov 8  }
   0xc   :  { %21 = dma.hbm_to_vmem [thread:$0]  %s171_s1, 256, %s16_s10, [#allocation5], %s136_s12, %s136_s12, %s137_s13  }
   0xd   :  { %131 = dma.done.wait [#allocation5], 256  }
   0xe   :  { %132 = vsyncadd [#allocation5], 4294967040  ;;  %v25_v0 = vlaneseq  ;;  %s39_s18 = smul.u32 2654435769, %s170_s0  ;;  %v63_v26 = vld [vmem:[#allocation4] sm:$0xff]  ;;  %v138_v28 = vmov 1.0  }
   0xf   :  { %v64_v30 = vld [vmem:[#allocation4 + $0x8] sm:$0xff]  ;;  %s139_s0 = smov [#allocation7]  }
  0x10   :  { %v26_v1 = vshrl.u32 %v25_v0, 7  ;;  %v29_v2 = vand.u32 127, %v25_v0  ;;  %v40_v5 = vstv %s39_s18  ;;  %s74_s1 = sshll.u32 %s139_s0, 4  ;;  %s75_s1 = int_to_ptr.vmem [resolvable:$true] %s74_s1 }
  0x11   :  { %s111_s19 = scalar_lea.vmem %s75_s1, 256  ;;  %p116_p6 = scmp.lt.s32.totalorder %s75_s1, %s75_s1 }
  0x12   :  { %v34_v3 = vmul.u32 128, %v26_v1  ;;  %v27_v4 = vadd.s32 8, %v26_v1  ;;  %p112_p5 = scmp.ne.s32.totalorder %s75_s1, %s111_s19  ;;  %p117_p7 = scmp.lt.s32.totalorder %s111_s19, %s111_s19 }
  0x14   :  { %v36_v6 = vadd.s32 %v34_v3, %v29_v2  ;;  %v35_v7 = vmul.u32 128, %v27_v4  ;;  %p118_p8 = por %p117_p7, %p116_p6 }
  0x16   :  { %v41_v8 = vxor.u32 %v40_v5, %v36_v6  ;;  %v37_v9 = vadd.s32 %v35_v7, %v29_v2  ;;  %p119_p9 = pnand %p118_p8, %p112_p5 }
  0x18   :  { %v43_v10 = vshrl.u32 %v41_v8, 16  ;;  %v42_v11 = vxor.u32 %v40_v5, %v37_v9 }
  0x1a   :  { %v45_v12 = vxor.u32 %v43_v10, %v41_v8  ;;  %v44_v13 = vshrl.u32 %v42_v11, 16 }
  0x1c   :  { %v47_v14 = vmul.u32 2246822507, %v45_v12  ;;  %v46_v15 = vxor.u32 %v44_v13, %v42_v11 }
  0x1e   :  { %v49_v16 = vshrl.u32 %v47_v14, 13  ;;  %v48_v17 = vmul.u32 2246822507, %v46_v15 }
  0x20   :  { %v51_v18 = vxor.u32 %v49_v16, %v47_v14  ;;  %v50_v19 = vshrl.u32 %v48_v17, 13 }
  0x22   :  { %v53_v20 = vmul.u32 3266489909, %v51_v18  ;;  %v52_v21 = vxor.u32 %v50_v19, %v48_v17 }
  0x24   :  { %v55_v22 = vshrl.u32 %v53_v20, 16  ;;  %v54_v23 = vmul.u32 3266489909, %v52_v21 }
  0x26   :  { %v57_v24 = vxor.u32 %v55_v22, %v53_v20  ;;  %v56_v25 = vshrl.u32 %v54_v23, 16 }
  0x28   :  { %vm59_vm0 = vcmp.ge.u32.totalorder %v57_v24, 429496730  ;;  %v58_v27 = vxor.u32 %v56_v25, %v54_v23 }
  0x29   :  { %v61_v29 = vsel %vm59_vm0, 2.1111112, %v138_v28 }
  0x2a   :  { %v65_v31 = vmul.f32 %v63_v26, %v61_v29  ;;  %vm60_vm1 = vcmp.ge.u32.totalorder %v58_v27, 429496730 }
  0x2b   :  { %v62_v32 = vsel %vm60_vm1, 2.1111112, %v138_v28 }
  0x2c   :  { %67 = vst [vmem:[#allocation7] sm:$0xff] %v65_v31  ;;  %v66_v33 = vmul.f32 %v64_v30, %v62_v32 }
  0x2e   :  { %68 = vst [vmem:[#allocation7 + $0x8] sm:$0xff] %v66_v33 }
  0x2f   :  { %122 = shalt.err (!%p119_p9)
}
  0x30   :  { %80 = dma.vmem_to_hbm [thread:$0]  %s75_s1, 256, %s172_s2, [#allocation6], %s136_s12, %s136_s12, %s137_s13  }
  0x31   :  { %133 = dma.done.wait [#allocation6], 256  }
  0x32   :  { %134 = vsyncadd [#allocation6], 4294967040 }
  0x33   :  { %84 = vsyncpa [#allocation5], 1 }
  0x34   :  { %85 = vsyncpa [#allocation6], 1 }

</bundles_post_ra>
